<compile_context>
chip_gen: v7x
topology: tpu7x:2x2x1
jax: 0.10.0
libtpu: 0.0.40
codegen_flags: <defaults>
</compile_context>

<pallas_src>
import functools
import math

import jax
import jax.numpy as jnp
from jax.experimental import pallas as pl
from jax.experimental.pallas import tpu as pltpu


# ----------------------------- kernels ------------------------------------ #

def _softmax_kernel(x_ref, o_ref, *, axis):
    x = x_ref[...].astype(jnp.float32)
    m = jnp.max(x, axis=axis, keepdims=True)
    e = jnp.exp(x - m)
    s = jnp.sum(e, axis=axis, keepdims=True)
    o_ref[...] = (e * (1.0 / s)).astype(o_ref.dtype)


def _masked_softmax_kernel(x_ref, mask_ref, o_ref, *, axis):
    # softmax(x)*mask / sum(softmax(x)*mask) == e*mask / sum(e*mask): the
    # softmax denominator cancels, so only ONE reduction + ONE reciprocal.
    x = x_ref[...].astype(jnp.float32)
    m = jnp.max(x, axis=axis, keepdims=True)
    e = jnp.exp(x - m)
    d = e * mask_ref[...].astype(jnp.float32)
    s = jnp.sum(d, axis=axis, keepdims=True)
    # 0 * (1/0) -> NaN for an all-zero mask row, matching torch's 0/0.
    o_ref[...] = (d * (1.0 / s)).astype(o_ref.dtype)


# --------------------------- tile selection -------------------------------- #

def _round_up(x, m):
    return ((x + m - 1) // m) * m


def _physical_vmem_bytes():
    """Best-effort query of physical VMEM; conservative (v7x) fallback."""
    try:
        info = pltpu.get_tpu_info()
        for attr in ("vmem_capacity_bytes", "vmem_size_bytes", "vmem_bytes"):
            v = getattr(info, attr, None)
            if v:
                return int(v)
    except Exception:
        pass
    return 64 << 20  # v7x has the smallest VMEM; safe everywhere.


def _choose_row_tile(rows, io_bytes_per_row, f32_tmp_bytes_per_row, sub):
    """Return (tile_rows, n_steps) with tile_rows * n_steps >= rows.

    Never produces partial blocks: the wrapper pads `rows` up to
    tile_rows * n_steps (only needed in the multi-step case, < n_steps*sub rows).
    """
    vmem = _physical_vmem_bytes()
    budget = (vmem * 3) // 5                     # headroom for compiler scratch
    # VMEM per row: double-buffered HBM<->VMEM tiles + in-kernel f32 temps.
    vmem_per_row = 2 * io_bytes_per_row + f32_tmp_bytes_per_row
    cap = max(sub, budget // max(vmem_per_row, 1))
    # TODO(synk): a single softmax row larger than VMEM would need an in-row
    # two-pass (streamed) reduction pipeline; not implemented.
    # ~8 MiB of HBM traffic per step amortizes the ~0.35us fixed step cost on
    # all generations (v5e saturates earlier; v7x benefits from the full 8 MiB).
    target = max(sub, (8 << 20) // max(io_bytes_per_row, 1))
    tile_cap = min(cap, target)

    n_steps = pl.cdiv(rows, tile_cap)
    if n_steps == 1:
        # Fits in one resident block.  Still use two balanced steps when each
        # half moves >= 4 MiB: keeps both v7x TensorCores busy and gives the
        # DMA pipeline something to overlap.
        if rows >= 2 * sub and (rows // 2) * io_bytes_per_row >= (4 << 20):
            n_steps = 2
        else:
            return rows, 1
    elif n_steps % 2:
        n_steps += 1                             # even steps: balanced megacore
    tile = _round_up(pl.cdiv(rows, n_steps), sub)
    return tile, n_steps


# ------------------------------ wrapper ------------------------------------ #

def masked_softmax(logit, mask=None, dim=-1):
    """Pallas TPU implementation of MaskedSoftmax.forward(logit, mask)."""
    shape = logit.shape
    ndim = logit.ndim
    dim = dim % ndim

    rows = math.prod(shape[:dim])
    d_sm = shape[dim]
    post = math.prod(shape[dim + 1:])

    if mask is not None:
        mask = jnp.broadcast_to(mask, shape)
        if jnp.issubdtype(mask.dtype, jnp.bool_):
            mask = mask.astype(jnp.int8)     # 1-byte, Pallas-friendly, still narrow

    # Free (contiguous-merge) reshapes only -- no transposes / extra HBM passes.
    if post == 1:
        view_shape, axis = (rows, d_sm), -1          # reduce along the lane axis
    else:
        view_shape, axis = (rows, d_sm, post), 1     # reduce along the sublane axis
    x = logit.reshape(view_shape)
    mk = mask.reshape(view_shape) if mask is not None else None

    in_itemsize = jnp.dtype(logit.dtype).itemsize
    mk_itemsize = jnp.dtype(mk.dtype).itemsize if mk is not None else 0
    elems_per_row = d_sm * post
    io_bytes_per_row = elems_per_row * (2 * in_itemsize + mk_itemsize)   # in+out+mask
    f32_tmp_bytes_per_row = elems_per_row * 4 * (3 if mk is not None else 2)
    min_itemsize = min([in_itemsize] + ([mk_itemsize] if mk is not None else []))
    sub = 8 * (4 // max(1, min_itemsize))            # sublane multiple per dtype

    tile, n_steps = _choose_row_tile(rows, io_bytes_per_row,
                                     f32_tmp_bytes_per_row, sub)
    padded_rows = tile * n_steps
    if padded_rows != rows:
        # Only when the array is bigger than one VMEM-resident block AND the
        # row count is not tile-aligned (pads < n_steps*sub rows).  Padded rows
        # are independent garbage and are sliced off below.
        pad = [(0, padded_rows - rows)] + [(0, 0)] * (len(view_shape) - 1)
        x = jnp.pad(x, pad)
        if mk is not None:
            mk = jnp.pad(mk, pad)

    block_shape = (tile,) + view_shape[1:]
    if len(view_shape) == 2:
        index_map = lambda i: (i, 0)
    else:
        index_map = lambda i: (i, 0, 0)
    blk = pl.BlockSpec(block_shape, index_map)

    out_shape = jax.ShapeDtypeStruct((padded_rows,) + view_shape[1:], logit.dtype)

    vmem_need = tile * (2 * io_bytes_per_row + f32_tmp_bytes_per_row)
    phys = _physical_vmem_bytes()
    vmem_limit = int(min(phys - (8 << 20), max(32 << 20, vmem_need + (8 << 20))))

    cparams = pltpu.CompilerParams(
        dimension_semantics=("parallel",),
        vmem_limit_bytes=vmem_limit,
    )
    elems = padded_rows * elems_per_row
    cost = pl.CostEstimate(
        flops=6 * elems,                     # sub, mul(s), cross-lane reductions
        transcendentals=elems,               # exp
        bytes_accessed=padded_rows * io_bytes_per_row,
    )

    if mk is None:
        out = pl.pallas_call(
            functools.partial(_softmax_kernel, axis=axis),
            out_shape=out_shape,
            grid_spec=pltpu.PrefetchScalarGridSpec(
                num_scalar_prefetch=0,
                grid=(n_steps,),
                in_specs=[blk],
                out_specs=blk,
            ),
            compiler_params=cparams,
            cost_estimate=cost,
        )(x)
    else:
        out = pl.pallas_call(
            functools.partial(_masked_softmax_kernel, axis=axis),
            out_shape=out_shape,
            grid_spec=pltpu.PrefetchScalarGridSpec(
                num_scalar_prefetch=0,
                grid=(n_steps,),
                in_specs=[blk, blk],
                out_specs=blk,
            ),
            compiler_params=cparams,
            cost_estimate=cost,
        )(x, mk)

    if padded_rows != rows:
        out = out[:rows]
    return out.reshape(shape)


# -------------------------------- main -------------------------------------- #

if __name__ == "__main__":
    key = jax.random.PRNGKey(0)
    ks = jax.random.split(key, 8)

    def ref_fn(lg, mk, dim):
        sm = jax.nn.softmax(lg - jnp.max(lg, axis=dim, keepdims=True), axis=dim)
        if mk is None:
            return sm
        d = sm * mk
        return d / jnp.sum(d, axis=dim, keepdims=True)

    checks = []

    # 1) typical attention shape, no mask, softmax over the last dim.
    lg = jax.random.normal(ks[0], (8, 32), jnp.float32)
    checks.append((masked_softmax(lg, None, dim=-1), ref_fn(lg, None, -1), "2d no-mask"))

    # 2) masked path, float32 mask (>=1 unmasked entry per row).
    mk = (jax.random.uniform(ks[1], (8, 32)) > 0.3).astype(jnp.float32)
    mk = mk.at[:, 0].set(1.0)
    checks.append((masked_softmax(lg, mk, dim=-1), ref_fn(lg, mk, -1), "2d masked"))

    # 3) bool mask passed natively (cast to f32 inside the kernel).
    mb = jax.random.uniform(ks[2], (8, 32)) > 0.5
    mb = mb.at[:, 0].set(True)
    checks.append((masked_softmax(lg, mb, dim=-1),
                   ref_fn(lg, mb.astype(jnp.float32), -1), "2d bool-mask"))

    # 4) softmax over a middle dim with odd sizes (previously-failing pattern).
    lg3 = jax.random.normal(ks[3], (5, 7, 33), jnp.float32)
    checks.append((masked_softmax(lg3, None, dim=1), ref_fn(lg3, None, 1), "3d dim=1"))
    mk3 = (jax.random.uniform(ks[4], (5, 7, 33)) > 0.4).astype(jnp.float32)
    mk3 = mk3.at[:, 0, :].set(1.0)
    checks.append((masked_softmax(lg3, mk3, dim=1), ref_fn(lg3, mk3, 1), "3d dim=1 masked"))

    # 5) odd row / lane counts, single-block path.
    lg4 = jax.random.normal(ks[5], (13, 27), jnp.float32)
    checks.append((masked_softmax(lg4, None, dim=-1), ref_fn(lg4, None, -1), "odd shape"))

    # 6) big enough to exercise the tiled (grid > 1) path, no padding.
    lg5 = jax.random.normal(ks[6], (8192, 128), jnp.float32)
    checks.append((masked_softmax(lg5, None, dim=-1), ref_fn(lg5, None, -1), "tiled no-mask"))

    # 7) tiled + rows not tile-aligned (padding path) + mask.
    lg6 = jax.random.normal(ks[7], (8191, 128), jnp.float32)
    mk6 = jnp.ones((8191, 128), jnp.float32)
    mk6 = mk6.at[:, 1:].set((jax.random.uniform(key, (8191, 127)) > 0.3).astype(jnp.float32))
    checks.append((masked_softmax(lg6, mk6, dim=-1), ref_fn(lg6, mk6, -1), "tiled masked"))

    for out, ref, name in checks:
        out = jax.block_until_ready(out)
        assert jnp.allclose(out, ref, atol=1e-5, rtol=1e-5), f"{name} mismatch"

    print("KERNEL_OK")
</pallas_src>

<mosaic_0001>
module attributes {stable_mosaic.version = 11 : i64} {
  func.func @_softmax_kernel(%arg0: i32, %arg1: memref<8x32xf32, #tpu.memory_space<vmem>>, %arg2: memref<8x32xf32, #tpu.memory_space<vmem>>) attributes {dimension_semantics = [#tpu.dimension_semantics<parallel>], iteration_bounds = array<i64: 1>, scalar_prefetch = 0 : i64, scratch_operands = 0 : i64, tpu.core_type = #tpu.core_type<tc>, window_params = [{transform_indices = @transform_0, window_bounds = array<i64: 8, 32>}, {transform_indices = @transform_1, window_bounds = array<i64: 8, 32>}]} {
    %c0 = arith.constant 0 : index
    %c0_0 = arith.constant 0 : index
    %0 = vector.load %arg1[%c0, %c0_0] : memref<8x32xf32, #tpu.memory_space<vmem>>, vector<8x32xf32>
    %cst = arith.constant dense<0xFF800000> : vector<8xf32>
    %1 = vector.multi_reduction <maximumf>, %0, %cst [1] : vector<8x32xf32> to vector<8xf32>
    %2 = vector.shape_cast %1 : vector<8xf32> to vector<8x1xf32>
    %3 = vector.broadcast %2 : vector<8x1xf32> to vector<8x32xf32>
    %4 = arith.subf %0, %3 : vector<8x32xf32>
    %5 = math.exp %4 : vector<8x32xf32>
    %cst_1 = arith.constant dense<0.000000e+00> : vector<8xf32>
    %6 = vector.multi_reduction <add>, %5, %cst_1 [1] : vector<8x32xf32> to vector<8xf32>
    %7 = vector.shape_cast %6 : vector<8xf32> to vector<8x1xf32>
    %cst_2 = arith.constant 1.000000e+00 : f32
    %8 = vector.broadcast %cst_2 : f32 to vector<8x1xf32>
    %9 = arith.divf %8, %7 : vector<8x1xf32>
    %10 = vector.broadcast %9 : vector<8x1xf32> to vector<8x32xf32>
    %11 = arith.mulf %5, %10 : vector<8x32xf32>
    %c0_3 = arith.constant 0 : index
    %c0_4 = arith.constant 0 : index
    %12 = vector.load %arg2[%c0_3, %c0_4] : memref<8x32xf32, #tpu.memory_space<vmem>>, vector<8x32xf32>
    tpu.vector_store %arg2[%c0_3, %c0_4], %11 {strides = array<i32>} : memref<8x32xf32, #tpu.memory_space<vmem>>, vector<8x32xf32>,
    return
  }
  func.func @transform_0(%arg0: i32) -> (i32, i32) {
    %c0_i32 = arith.constant 0 : i32
    %c0_i32_0 = arith.constant 0 : i32
    return %arg0, %c0_i32 : i32, i32
  }
  func.func @transform_1(%arg0: i32) -> (i32, i32) {
    %c0_i32 = arith.constant 0 : i32
    %c0_i32_0 = arith.constant 0 : i32
    return %arg0, %c0_i32 : i32, i32
  }
}

</mosaic_0001>

<bundles_post_ra>
// kernel: tpu_custom_call.1
= control target key start
LH: loop header
LB: loop body
LE: loop exit
PB: predicated region body
PF: predicated region fallthrough
CT: control target
= control target key end

     0   :  { %6 = vsyncpa [#allocation3], 0  ;;  %s144_s0 = inlined_call_operand.hbm [shape: f32[8,32], index: 0, kind: input, shape index: {}]   ;;  %s145_s1 = inlined_call_operand.hbm [shape: f32[8,32], index: 1, kind: output, shape index: {}]  }
   0x1   :  { %7 = vsyncpa [#allocation4], 0  ;;  %s105_s6 = smov [#allocation2]   ;;  %s57_s10 = scalar_lea.hbm %s144_s0, 128 }
   0x2   :  { %s14_s7 = sshll.u32 %s105_s6, 4  ;;  %p58_p0 = scmp.ne.s32.totalorder %s144_s0, %s57_s10  ;;  %s15_s7 = int_to_ptr.vmem [resolvable:$true] %s14_s7 }
   0x3   :  { %p61_p1 = scmp.lt.u32.totalorder %s57_s10, %s144_s0 }
   0x5   :  { %p63_p2 = pnand %p61_p1, %p58_p0 }
   0x7   :  { %66 = shalt.err (!%p63_p2)
}
   0x8   :  { %s67_s15 = scalar_lea.vmem %s15_s7, 128  ;;  %p72_p4 = scmp.lt.s32.totalorder %s15_s7, %s15_s7 }
   0x9   :  { %p68_p3 = scmp.ne.s32.totalorder %s15_s7, %s67_s15  ;;  %p73_p5 = scmp.lt.s32.totalorder %s67_s15, %s67_s15 }
   0xb   :  { %p74_p6 = por %p73_p5, %p72_p4 }
   0xd   :  { %p75_p7 = pnand %p74_p6, %p68_p3 }
   0xf   :  { %78 = shalt.err (!%p75_p7)
}
  0x10   :  { %17 = dma.hbm_to_vmem [thread:$0]  %s144_s0, 128, %s15_s7, [#allocation3]  }
  0x11   :  { %101 = dma.done.wait [#allocation3], 128  }
  0x12   :  { %102 = vsyncadd [#allocation3], 4294967168  ;;  %vm22_vm0 = vcmask 261120   ;;  %v21_v0 = vld [vmem:[#allocation2] sm:$0xff]  ;;  %s106_s18 = smov [#allocation5]  }
  0x13   :  { %v23_v1 = vsel %vm22_vm0, %v21_v0, -inf  ;;  %s42_s19 = sshll.u32 %s106_s18, 4  ;;  %s43_s19 = int_to_ptr.vmem [resolvable:$true] %s42_s19 }
  0x14   :  { %24 = vmax.xlane.f32.xlu0 %v23_v1  ;;  %s79_s0 = scalar_lea.vmem %s43_s19, 128  ;;  %p84_p9 = scmp.lt.s32.totalorder %s43_s19, %s43_s19 }
  0x15   :  { %p80_p8 = scmp.ne.s32.totalorder %s43_s19, %s79_s0  ;;  %p85_p10 = scmp.lt.s32.totalorder %s79_s0, %s79_s0 }
  0x17   :  { %p86_p11 = por %p85_p10, %p84_p9 }
  0x19   :  { %p87_p12 = pnand %p86_p11, %p80_p8 }
  0xa1   :  { %v25_v2 = vpop.xlane.xlu0 %24 }
  0xa2   :  { %v26_v3 = vsub.f32 %v21_v0, %v25_v2 }
  0xa4   :  { %v27_v4 = vmul.f32 1.442695, %v26_v3 }
  0xa6   :  { %53 = vpow2.f32 %v27_v4 }
  0xb0   :  { %v54_v5 = vpop.eup %53 }
  0xb1   :  { %v29_v6 = vsel %vm22_vm0, %v54_v5, 0.0 }
  0xb2   :  { %30 = vadd.xlane.f32.xlu0 %v29_v6 }
 0x13f   :  { %v31_v7 = vpop.xlane.xlu0 %30 }
 0x140   :  { %55 = vrcp.f32 %v31_v7 }
 0x14a   :  { %v56_v8 = vpop.eup %55 }
 0x14b   :  { %v34_v9 = vmul.f32 %v56_v8, %v54_v5 }
 0x14d   :  { %35 = vst.msk [vmem:[#allocation5] sm:$0xff] %vm22_vm0, %v34_v9 }
 0x14e   :  { %90 = shalt.err (!%p87_p12)
}
 0x14f   :  { %s91_s22 = scalar_lea.hbm %s145_s1, 128 }
 0x150   :  { %p92_p13 = scmp.ne.s32.totalorder %s145_s1, %s91_s22  ;;  %p95_p0 = scmp.lt.u32.totalorder %s91_s22, %s145_s1 }
 0x152   :  { %p97_p1 = pnand %p95_p0, %p92_p13 }
 0x154   :  { %100 = shalt.err (!%p97_p1)
}
 0x155   :  { %45 = dma.vmem_to_hbm [thread:$0]  %s43_s19, 128, %s145_s1, [#allocation4]  }
 0x156   :  { %103 = dma.done.wait [#allocation4], 128  }
 0x157   :  { %104 = vsyncadd [#allocation4], 4294967168 }
 0x158   :  { %49 = vsyncpa [#allocation3], 1 }
 0x159   :  { %50 = vsyncpa [#allocation4], 1 }

</bundles_post_ra>
